<compile_context>
chip_gen: v7x
topology: tpu7x:2x2x1
jax: 0.10.0
libtpu: 0.0.40
codegen_flags: <defaults>
</compile_context>

<pallas_src>
import functools
import math
from typing import NamedTuple, Optional

import jax
import jax.numpy as jnp
from jax.experimental import pallas as pl
from jax.experimental.pallas import tpu as pltpu


# --------------------------------------------------------------------------- #
# Helpers
# --------------------------------------------------------------------------- #
def _round_up(x, m):
    return ((x + m - 1) // m) * m


def _cdiv(a, b):
    return -(-a // b)


@functools.lru_cache(maxsize=1)
def _device_kind():
    try:
        return jax.devices()[0].device_kind.lower()
    except Exception:
        return ""


def _base_tiles():
    """Per-generation (TM, TN, TK) budgets, sized for the MXU/HBM ridge point."""
    kind = _device_kind()
    if "v7" in kind:
        # v7x ridge ~311 flops/byte; 1024x1024 -> 512.  ~12-16 MiB of tiles, well
        # under the 48 MiB cap we set below (64 MiB physical per TC).
        return 1024, 1024, 512
    if "v5" in kind:
        # v5e ridge ~240 flops/byte; 768x768 -> 384.
        return 768, 768, 512
    # v6e / default ridge ~680 flops/byte (bf16); 1536x1536 -> 768.
    # f32 tiles: ~30 MiB double-buffered, fine in 128 MiB VMEM with a 96 MiB limit.
    return 1536, 1536, 512


def _vmem_cap():
    # Leave headroom on v7x (64 MiB physical); unlock big tiles on 128 MiB parts.
    return (48 << 20) if "v7" in _device_kind() else (96 << 20)


def _fit_tile(dim, base, align):
    """Largest tile <= ~base that minimizes padding: split dim into
    n = ceil(dim/base) equal aligned tiles.  Returns (tile, padded_dim)."""
    d = max(int(dim), 1)
    n = _cdiv(d, base)
    tile = _round_up(_cdiv(d, n), align)
    return tile, n * tile


# --------------------------------------------------------------------------- #
# Kernels
# --------------------------------------------------------------------------- #
def _linear_kernel_f32(x_ref, w_ref, b_ref, o_ref):
    # x_ref (TM,TK), w_ref (TK,TN), b_ref (1,TN) f32, o_ref (TM,TN) f32.
    # o_ref is resident in VMEM across the K grid axis and used as the accumulator.
    k = pl.program_id(2)
    part = jnp.dot(x_ref[...], w_ref[...], preferred_element_type=jnp.float32)

    @pl.when(k == 0)
    def _():
        o_ref[...] = part

    @pl.when(k > 0)
    def _():
        o_ref[...] += part

    @pl.when(k == pl.num_programs(2) - 1)
    def _():
        o_ref[...] += b_ref[...]


def _linear_kernel_acc(x_ref, w_ref, b_ref, o_ref, acc_ref):
    # Same as above but with an f32 VMEM accumulator for non-f32 output dtypes.
    k = pl.program_id(2)
    part = jnp.dot(x_ref[...], w_ref[...], preferred_element_type=jnp.float32)

    @pl.when(k == 0)
    def _():
        acc_ref[...] = part

    @pl.when(k > 0)
    def _():
        acc_ref[...] += part

    @pl.when(k == pl.num_programs(2) - 1)
    def _():
        o_ref[...] = (acc_ref[...] + b_ref[...]).astype(o_ref.dtype)


# --------------------------------------------------------------------------- #
# Parameter preparation (one-time): transpose + pad weight, f32 bias
# --------------------------------------------------------------------------- #
class PreparedLinear(NamedTuple):
    w_t: jax.Array   # (Kp, Np) padded transposed weight, compute dtype
    b: jax.Array     # (1, Np) float32 bias (zeros if module has no bias)
    d_in: int
    d_out: int
    tn: int
    tk: int


def prepare_xavier_linear(weight, bias: Optional[jax.Array] = None,
                          compute_dtype=None) -> PreparedLinear:
    """One-time prep: pre-transpose weight to (d_in, d_out), pad to tile
    multiples, and stage the bias as float32.  Hoists all per-call HBM padding
    passes out of the forward path."""
    d_out, d_in = weight.shape
    compute_dtype = jnp.dtype(compute_dtype or weight.dtype)
    _, bTN, bTK = _base_tiles()
    TN, Np = _fit_tile(d_out, bTN, 128)   # lane-dense output tiles (>=128 wide)
    TK, Kp = _fit_tile(d_in, bTK, 128)

    w_t = jnp.transpose(weight).astype(compute_dtype)          # (d_in, d_out)
    if (Kp, Np) != (d_in, d_out):
        w_t = jnp.pad(w_t, ((0, Kp - d_in), (0, Np - d_out)))  # zeros are exact

    if bias is None:
        b = jnp.zeros((1, Np), jnp.float32)
    else:
        b = bias.reshape(1, d_out).astype(jnp.float32)
        if Np != d_out:
            b = jnp.pad(b, ((0, 0), (0, Np - d_out)))

    return PreparedLinear(w_t, b, int(d_in), int(d_out), int(TN), int(TK))


# --------------------------------------------------------------------------- #
# Forward
# --------------------------------------------------------------------------- #
def xavier_linear_prepared(x, p: PreparedLinear):
    """y = x @ W^T + b using pre-transposed / pre-padded parameters."""
    orig_shape = x.shape
    assert orig_shape[-1] == p.d_in
    out_dtype = x.dtype
    M = int(math.prod(orig_shape[:-1])) if len(orig_shape) > 1 else 1
    x2 = x.reshape(M, p.d_in)
    if x2.dtype != p.w_t.dtype:
        x2 = x2.astype(p.w_t.dtype)

    TN, TK = p.tn, p.tk
    Kp, Np = p.w_t.shape
    bTM, _, _ = _base_tiles()
    TM, Mp = _fit_tile(M, bTM, 8)

    # v7x megacore: keep >=2 (i,j) tiles so "parallel" axes can shard across
    # both TensorCores instead of collapsing to a 1x1xK grid.
    if "v7" in _device_kind() and (Mp // TM) * (Np // TN) == 1 and M > 8:
        TM = _round_up(_cdiv(M, 2), 8)
        Mp = 2 * TM

    if (Mp, Kp) != (M, p.d_in):
        x2 = jnp.pad(x2, ((0, Mp - M), (0, Kp - p.d_in)))

    grid = (Mp // TM, Np // TN, Kp // TK)

    in_itemsize = jnp.dtype(p.w_t.dtype).itemsize
    out_itemsize = jnp.dtype(out_dtype).itemsize
    f32_out = jnp.dtype(out_dtype) == jnp.dtype(jnp.float32)

    # Double-buffered x/w/out tiles + bias (+ f32 accumulator if needed).
    vmem_est = (2 * (TM * TK + TK * TN) * in_itemsize
                + 2 * TN * 4
                + 2 * TM * TN * out_itemsize
                + (0 if f32_out else TM * TN * 4))
    vmem_limit = int(min(max(vmem_est + (8 << 20), 32 << 20), _vmem_cap()))

    cost = pl.CostEstimate(
        flops=2 * Mp * Kp * Np,
        transcendentals=0,
        bytes_accessed=(Mp * Kp + Kp * Np) * in_itemsize + Np * 4 + Mp * Np * out_itemsize,
    )

    kernel = _linear_kernel_f32 if f32_out else _linear_kernel_acc
    scratch = [] if f32_out else [pltpu.VMEM((TM, TN), jnp.float32)]

    out = pl.pallas_call(
        kernel,
        out_shape=jax.ShapeDtypeStruct((Mp, Np), out_dtype),
        grid_spec=pltpu.PrefetchScalarGridSpec(
            num_scalar_prefetch=0,
            grid=grid,
            in_specs=[
                pl.BlockSpec((TM, TK), lambda i, j, k: (i, k)),   # x tile
                pl.BlockSpec((TK, TN), lambda i, j, k: (k, j)),   # W^T tile (d_in, d_out)
                pl.BlockSpec((1, TN), lambda i, j, k: (0, j)),    # f32 bias tile
            ],
            out_specs=pl.BlockSpec((TM, TN), lambda i, j, k: (i, j)),
            scratch_shapes=scratch,
        ),
        compiler_params=pltpu.CompilerParams(
            dimension_semantics=("parallel", "parallel", "arbitrary"),
            vmem_limit_bytes=vmem_limit,
        ),
        cost_estimate=cost,
    )(x2, p.w_t, p.b)

    out = out[:M, :p.d_out]
    return out.reshape(*orig_shape[:-1], p.d_out)


def xavier_linear(x, weight, bias=None):
    """Convenience wrapper matching torch.nn.Linear semantics:
    x (..., d_in), weight (d_out, d_in), bias (d_out,) or None.
    For repeated calls, do `p = prepare_xavier_linear(weight, bias)` once and
    call `xavier_linear_prepared(x, p)` to keep padding/transpose off the hot path."""
    return xavier_linear_prepared(x, prepare_xavier_linear(weight, bias,
                                                           compute_dtype=x.dtype))


# --------------------------------------------------------------------------- #
# Parameter init mirroring the module's __init__
# --------------------------------------------------------------------------- #
def init_xavier_linear_params(key, d_in, d_out, bias=True, dtype=jnp.float32):
    """weight ~ xavier_normal (gain=1); bias at nn.Linear default
    (uniform(-1/sqrt(d_in), 1/sqrt(d_in)))."""
    kw, kb = jax.random.split(key)
    std = math.sqrt(2.0 / (d_in + d_out))
    weight = std * jax.random.normal(kw, (d_out, d_in), dtype=dtype)
    if bias:
        bound = 1.0 / math.sqrt(d_in)
        b = jax.random.uniform(kb, (d_out,), dtype=dtype, minval=-bound, maxval=bound)
    else:
        b = None
    return weight, b


# --------------------------------------------------------------------------- #
# Demo / self-test
# --------------------------------------------------------------------------- #
if __name__ == "__main__":
    key = jax.random.PRNGKey(0)
    k_x, k_p = jax.random.split(key)

    batch, seq, d_in, d_out = 2, 8, 32, 32
    x = jax.random.normal(k_x, (batch, seq, d_in), dtype=jnp.float32)
    weight, bias = init_xavier_linear_params(k_p, d_in, d_out, bias=True)

    # Prepared path (one-time weight transpose/pad, per-call kernel).
    prepared = prepare_xavier_linear(weight, bias, compute_dtype=x.dtype)
    y = xavier_linear_prepared(x, prepared)
    y = jax.block_until_ready(y)
    y_ref = x @ weight.T + bias
    assert y.shape == (batch, seq, d_out)
    assert jnp.allclose(y, y_ref, atol=1e-5, rtol=1e-5)

    # Convenience path, no bias (zero f32 bias pass-through, same kernel).
    y_nb = xavier_linear(x, weight, None)
    y_nb = jax.block_until_ready(y_nb)
    assert jnp.allclose(y_nb, x @ weight.T, atol=1e-5, rtol=1e-5)

    print("KERNEL_OK")
</pallas_src>

<mosaic_0001>
module attributes {stable_mosaic.version = 11 : i64} {
  func.func @_linear_kernel_f32(%arg0: i32, %arg1: i32, %arg2: i32, %arg3: memref<16x128xf32, #tpu.memory_space<vmem>>, %arg4: memref<128x128xf32, #tpu.memory_space<vmem>>, %arg5: memref<1x128xf32, #tpu.memory_space<vmem>>, %arg6: memref<16x128xf32, #tpu.memory_space<vmem>>) attributes {dimension_semantics = [#tpu.dimension_semantics<parallel>, #tpu.dimension_semantics<parallel>, #tpu.dimension_semantics<arbitrary>], iteration_bounds = array<i64: 1, 1, 1>, scalar_prefetch = 0 : i64, scratch_operands = 0 : i64, tpu.core_type = #tpu.core_type<tc>, window_params = [{transform_indices = @transform_0, window_bounds = array<i64: 16, 128>}, {transform_indices = @transform_1, window_bounds = array<i64: 128, 128>}, {transform_indices = @transform_2, window_bounds = array<i64: 1, 128>}, {transform_indices = @transform_3, window_bounds = array<i64: 16, 128>}]} {
    %c0 = arith.constant 0 : index
    %c0_0 = arith.constant 0 : index
    %0 = vector.load %arg3[%c0, %c0_0] : memref<16x128xf32, #tpu.memory_space<vmem>>, vector<16x128xf32>
    %c0_1 = arith.constant 0 : index
    %c0_2 = arith.constant 0 : index
    %1 = vector.load %arg4[%c0_1, %c0_2] : memref<128x128xf32, #tpu.memory_space<vmem>>, vector<128x128xf32>
    %cst = arith.constant dense<0.000000e+00> : vector<16x128xf32>
    %2 = tpu.matmul %0, %1, %cst {dimension_numbers = #tpu.dot_dimension_numbers<[1], [0], [0], [1], [0, 0, 1, 1], [], []>} : vector<16x128xf32>, vector<128x128xf32>, vector<16x128xf32> -> vector<16x128xf32>
    %c0_i32 = arith.constant 0 : i32
    %3 = arith.cmpi eq, %arg2, %c0_i32 : i32
    %4 = arith.extui %3 : i1 to i32
    %c0_i32_3 = arith.constant 0 : i32
    %5 = arith.cmpi ne, %4, %c0_i32_3 : i32
    scf.if %5 {
      %c0_8 = arith.constant 0 : index
      %c0_9 = arith.constant 0 : index
      %12 = vector.load %arg6[%c0_8, %c0_9] : memref<16x128xf32, #tpu.memory_space<vmem>>, vector<16x128xf32>
      tpu.vector_store %arg6[%c0_8, %c0_9], %2 {strides = array<i32>} : memref<16x128xf32, #tpu.memory_space<vmem>>, vector<16x128xf32>,
    } else {
    }
    %c0_i32_4 = arith.constant 0 : i32
    %6 = arith.cmpi sgt, %arg2, %c0_i32_4 : i32
    %7 = arith.extui %6 : i1 to i32
    %c0_i32_5 = arith.constant 0 : i32
    %8 = arith.cmpi ne, %7, %c0_i32_5 : i32
    scf.if %8 {
      %c0_8 = arith.constant 0 : index
      %c0_9 = arith.constant 0 : index
      %12 = vector.load %arg6[%c0_8, %c0_9] : memref<16x128xf32, #tpu.memory_space<vmem>>, vector<16x128xf32>
      %13 = arith.addf %12, %2 : vector<16x128xf32>
      %c0_10 = arith.constant 0 : index
      %c0_11 = arith.constant 0 : index
      %14 = vector.load %arg6[%c0_10, %c0_11] : memref<16x128xf32, #tpu.memory_space<vmem>>, vector<16x128xf32>
      tpu.vector_store %arg6[%c0_10, %c0_11], %13 {strides = array<i32>} : memref<16x128xf32, #tpu.memory_space<vmem>>, vector<16x128xf32>,
    } else {
    }
    %c0_i32_6 = arith.constant 0 : i32
    %9 = arith.cmpi eq, %arg2, %c0_i32_6 : i32
    %10 = arith.extui %9 : i1 to i32
    %c0_i32_7 = arith.constant 0 : i32
    %11 = arith.cmpi ne, %10, %c0_i32_7 : i32
    scf.if %11 {
      %c0_8 = arith.constant 0 : index
      %c0_9 = arith.constant 0 : index
      %12 = vector.load %arg6[%c0_8, %c0_9] : memref<16x128xf32, #tpu.memory_space<vmem>>, vector<16x128xf32>
      %c0_10 = arith.constant 0 : index
      %c0_11 = arith.constant 0 : index
      %13 = vector.load %arg5[%c0_10, %c0_11] : memref<1x128xf32, #tpu.memory_space<vmem>>, vector<1x128xf32>
      %14 = vector.broadcast %13 : vector<1x128xf32> to vector<16x128xf32>
      %15 = arith.addf %12, %14 : vector<16x128xf32>
      %c0_12 = arith.constant 0 : index
      %c0_13 = arith.constant 0 : index
      %16 = vector.load %arg6[%c0_12, %c0_13] : memref<16x128xf32, #tpu.memory_space<vmem>>, vector<16x128xf32>
      tpu.vector_store %arg6[%c0_12, %c0_13], %15 {strides = array<i32>} : memref<16x128xf32, #tpu.memory_space<vmem>>, vector<16x128xf32>,
    } else {
    }
    return
  }
  func.func @transform_0(%arg0: i32, %arg1: i32, %arg2: i32) -> (i32, i32) {
    %c0_i32 = arith.constant 0 : i32
    return %arg0, %arg2 : i32, i32
  }
  func.func @transform_1(%arg0: i32, %arg1: i32, %arg2: i32) -> (i32, i32) {
    %c0_i32 = arith.constant 0 : i32
    return %arg2, %arg1 : i32, i32
  }
  func.func @transform_2(%arg0: i32, %arg1: i32, %arg2: i32) -> (i32, i32) {
    %c0_i32 = arith.constant 0 : i32
    %c0_i32_0 = arith.constant 0 : i32
    return %c0_i32, %arg1 : i32, i32
  }
  func.func @transform_3(%arg0: i32, %arg1: i32, %arg2: i32) -> (i32, i32) {
    %c0_i32 = arith.constant 0 : i32
    return %arg0, %arg1 : i32, i32
  }
}

</mosaic_0001>

<bundles_post_ra>
// kernel: tpu_custom_call.1
= control target key start
LH: loop header
LB: loop body
LE: loop exit
PB: predicated region body
PF: predicated region fallthrough
CT: control target
= control target key end

     0   :  { %8 = vsyncpa [#allocation3], 0  ;;  %s422_s0 = inlined_call_operand.hbm [shape: f32[16,128], index: 0, kind: input, shape index: {}]   ;;  %s423_s1 = inlined_call_operand.hbm [shape: f32[128,128], index: 1, kind: input, shape index: {}]   ;;  %s424_s2 = inlined_call_operand.vmem [shape: f32[1,128], index: 2, kind: input, shape index: {}]   ;;  %s425_s3 = inlined_call_operand.hbm [shape: f32[16,128], index: 3, kind: output, shape index: {}]  }
   0x1   :  { %9 = vsyncpa [#allocation6], 0 }
   0x2   :  { %10 = vsyncpa [#allocation4], 0  ;;  %s349_s12 = smov [#allocation2]   ;;  %s277_s16 = scalar_lea.hbm %s422_s0, 256 }
   0x3   :  { %s16_s13 = sshll.u32 %s349_s12, 4  ;;  %p278_p0 = scmp.ne.s32.totalorder %s422_s0, %s277_s16  ;;  %s17_s13 = int_to_ptr.vmem [resolvable:$true] %s16_s13 }
   0x4   :  { %p281_p1 = scmp.lt.u32.totalorder %s277_s16, %s422_s0 }
   0x6   :  { %p283_p2 = pnand %p281_p1, %p278_p0 }
   0x8   :  { %286 = shalt.err (!%p283_p2)
}
   0x9   :  { %s287_s21 = scalar_lea.vmem %s17_s13, 256  ;;  %p292_p4 = scmp.lt.s32.totalorder %s17_s13, %s17_s13 }
   0xa   :  { %p288_p3 = scmp.ne.s32.totalorder %s17_s13, %s287_s21  ;;  %p293_p5 = scmp.lt.s32.totalorder %s287_s21, %s287_s21 }
   0xc   :  { %p294_p6 = por %p293_p5, %p292_p4 }
   0xe   :  { %p295_p7 = pnand %p294_p6, %p288_p3 }
  0x10   :  { %298 = shalt.err (!%p295_p7)
}
  0x11   :  { %s350_s22 = smov 128   ;;  %s351_s23 = smov 8  }
  0x12   :  { %22 = dma.hbm_to_vmem [thread:$0]  %s422_s0, 256, %s17_s13, [#allocation3], %s350_s22, %s350_s22, %s351_s23  }
  0x13   :  { %s352_s26 = smov [#allocation5]   ;;  %s299_s30 = scalar_lea.hbm %s423_s1, 2048 }
  0x14   :  { %s28_s27 = sshll.u32 %s352_s26, 4  ;;  %p300_p8 = scmp.ne.s32.totalorder %s423_s1, %s299_s30  ;;  %s29_s27 = int_to_ptr.vmem [resolvable:$true] %s28_s27 }
  0x15   :  { %p303_p9 = scmp.lt.u32.totalorder %s299_s30, %s423_s1 }
  0x17   :  { %p305_p10 = pnand %p303_p9, %p300_p8 }
  0x19   :  { %308 = shalt.err (!%p305_p10)
}
  0x1a   :  { %s309_s8 = scalar_lea.vmem %s29_s27, 2048  ;;  %p314_p12 = scmp.lt.s32.totalorder %s29_s27, %s29_s27 }
  0x1b   :  { %p310_p11 = scmp.ne.s32.totalorder %s29_s27, %s309_s8  ;;  %p315_p13 = scmp.lt.s32.totalorder %s309_s8, %s309_s8 }
  0x1d   :  { %p316_p0 = por %p315_p13, %p314_p12 }
  0x1f   :  { %p317_p1 = pnand %p316_p0, %p310_p11 }
  0x21   :  { %320 = shalt.err (!%p317_p1)
}
  0x22   :  { %34 = dma.hbm_to_vmem [thread:$0]  %s423_s1, 2048, %s29_s27, [#allocation6], %s350_s22, %s350_s22, %s351_s23  }
  0x23   :  { %343 = dma.done.wait [#allocation3], 256  }
  0x24   :  { %344 = vsyncadd [#allocation3], 4294967040 }
  0x25   :  { %345 = dma.done.wait [#allocation6], 2048  }
  0x26   :  { %346 = vsyncadd [#allocation6], 4294965248  ;;  %v45_v0 = vld [vmem:[#allocation5] sm:$0xff]  ;;  %v46_v1 = vld [vmem:[#allocation5 + $0x8] sm:$0xff]  ;;  %s353_s11 = smov [#allocation7]  }
  0x27   :  { %v47_v2 = vld [vmem:[#allocation5 + $0x10] sm:$0xff]  ;;  %v240_v3 = vpack.c.bf16 %v46_v1, %v45_v0  ;;  %v48_v4 = vld [vmem:[#allocation5 + $0x18] sm:$0xff]  ;;  %v49_v6 = vld [vmem:[#allocation5 + $0x20] sm:$0xff]  ;;  %s173_s12 = sshll.u32 %s353_s11, 4  ;;  %s174_s12 = int_to_ptr.vmem [resolvable:$true] %s173_s12 }
  0x28   :  { %v244_v5 = vpack.c.bf16 %v48_v4, %v47_v2  ;;  %v50_v7 = vld [vmem:[#allocation5 + $0x28] sm:$0xff]  ;;  %v43_v9 = vld [vmem:[#allocation2] sm:$0xff]  ;;  %v52_v11 = vld [vmem:[#allocation5 + $0x38] sm:$0xff]  ;;  %s321_s13 = scalar_lea.vmem %s174_s12, 256  ;;  %p326_p3 = scmp.lt.s32.totalorder %s174_s12, %s174_s12 }
  0x29   :  { %241 = vmatprep.subr.bf16.mxu0 %v240_v3  ;;  %v248_v8 = vpack.c.bf16 %v50_v7, %v49_v6  ;;  %v51_v10 = vld [vmem:[#allocation5 + $0x30] sm:$0xff]  ;;  %237 = vmatprep.mubr.f32.mxu0 %v43_v9  ;;  %v53_v13 = vld [vmem:[#allocation5 + $0x40] sm:$0xff]  ;;  %v54_v14 = vld [vmem:[#allocation5 + $0x48] sm:$0xff]  ;;  %p322_p2 = scmp.ne.s32.totalorder %s174_s12, %s321_s13  ;;  %p327_p4 = scmp.lt.s32.totalorder %s321_s13, %s321_s13 }
  0x2a   :  { %243 = vmatpush3.bf16.msra.mxu0 %v240_v3  ;;  %v252_v12 = vpack.c.bf16 %v52_v11, %v51_v10  ;;  %v256_v15 = vpack.c.bf16 %v54_v14, %v53_v13  ;;  %v55_v16 = vld [vmem:[#allocation5 + $0x50] sm:$0xff]  ;;  %v56_v17 = vld [vmem:[#allocation5 + $0x58] sm:$0xff]  ;;  %v57_v19 = vld [vmem:[#allocation5 + $0x60] sm:$0xff] }
  0x2b   :  { %245 = vmatprep.subr.bf16.mxu0 %v244_v5  ;;  %v260_v18 = vpack.c.bf16 %v56_v17, %v55_v16  ;;  %v58_v20 = vld [vmem:[#allocation5 + $0x68] sm:$0xff]  ;;  %v59_v22 = vld [vmem:[#allocation5 + $0x70] sm:$0xff]  ;;  %v60_v23 = vld [vmem:[#allocation5 + $0x78] sm:$0xff]  ;;  %p328_p5 = por %p327_p4, %p326_p3 }
  0x2c   :  { %v264_v21 = vpack.c.bf16 %v58_v20, %v57_v19  ;;  %v268_v24 = vpack.c.bf16 %v60_v23, %v59_v22  ;;  %v44_v25 = vld [vmem:[#allocation2 + $0x8] sm:$0xff]  ;;  %v186_v26 = vld [vmem:[%s424_s2] ss:$0 sm:$0xff] }
  0x2d   :  { %p329_p6 = pnand %p328_p5, %p322_p2 }
  0x2e   :  { %247 = vmatpush3.bf16.msra.mxu0 %v244_v5 }
  0x2f   :  { %249 = vmatprep.subr.bf16.mxu0 %v248_v8 }
  0x32   :  { %251 = vmatpush3.bf16.msra.mxu0 %v248_v8 }
  0x33   :  { %253 = vmatprep.subr.bf16.mxu0 %v252_v12 }
  0x36   :  { %255 = vmatpush3.bf16.msra.mxu0 %v252_v12 }
  0x37   :  { %257 = vmatprep.subr.bf16.mxu0 %v256_v15 }
  0x3a   :  { %259 = vmatpush3.bf16.msra.mxu0 %v256_v15 }
  0x3b   :  { %261 = vmatprep.subr.bf16.mxu0 %v260_v18 }
  0x3e   :  { %263 = vmatpush3.bf16.msra.mxu0 %v260_v18 }
  0x3f   :  { %265 = vmatprep.subr.bf16.mxu0 %v264_v21 }
  0x42   :  { %267 = vmatpush3.bf16.msra.mxu0 %v264_v21 }
  0x43   :  { %269 = vmatprep.subr.bf16.mxu0 %v268_v24 }
  0x46   :  { %271 = vmatpush3.bf16.msra.mxu0 %v268_v24 }
  0x49   :  { %238 = vmatmul.mubr.f32.vlgmr.msra.gmra.mrb[0].mxu0 %v44_v25 }
 0x11c   :  { %v239_v27 = vpop.f32.mrb[0].mxu0 }
 0x11d   :  { %v127_v28 = vpop.f32.mrb[1].mxu0  ;;  %v165_v29 = vadd.f32 %v239_v27, %v186_v26 }
 0x11e   :  { %v164_v30 = vadd.f32 %v186_v26, %v127_v28 }
 0x11f   :  { %167 = vst [vmem:[#allocation7 + $0x8] sm:$0xff] %v165_v29 }
 0x120   :  { %166 = vst [vmem:[#allocation7] sm:$0xff] %v164_v30 }
 0x121   :  { %332 = shalt.err (!%p329_p6)
}
 0x122   :  { %s333_s2 = scalar_lea.hbm %s425_s3, 256 }
 0x123   :  { %p334_p7 = scmp.ne.s32.totalorder %s425_s3, %s333_s2  ;;  %p337_p8 = scmp.lt.u32.totalorder %s333_s2, %s425_s3 }
 0x125   :  { %p339_p9 = pnand %p337_p8, %p334_p7 }
 0x127   :  { %342 = shalt.err (!%p339_p9)
}
 0x128   :  { %179 = dma.vmem_to_hbm [thread:$0]  %s174_s12, 256, %s425_s3, [#allocation4], %s350_s22, %s350_s22, %s351_s23  }
 0x129   :  { %347 = dma.done.wait [#allocation4], 256  }
 0x12a   :  { %348 = vsyncadd [#allocation4], 4294967040 }
 0x12b   :  { %183 = vsyncpa [#allocation3], 1 }
 0x12c   :  { %184 = vsyncpa [#allocation6], 1 }
 0x12d   :  { %185 = vsyncpa [#allocation4], 1 }

</bundles_post_ra>
